<compile_context>
chip_gen: v7x
topology: tpu7x:2x2x1
jax: 0.10.0
libtpu: 0.0.40
codegen_flags: <defaults>
</compile_context>

<pallas_src>
import numpy as np

import jax
import jax.numpy as jnp
from jax.experimental import pallas as pl
from jax.experimental.pallas import tpu as pltpu


# ----------------------------------------------------------------------------
# Pallas smoke-test kernel: raw HBM -> HBM copy via a single DMA.
# ----------------------------------------------------------------------------
def _hbm_copy_kernel(x_hbm, o_hbm, sem):
    # One contiguous HBM->HBM DMA: no VMEM staging, no grid, no tiling.
    cp = pltpu.make_async_copy(x_hbm, o_hbm, sem)
    cp.start()
    cp.wait()


def pallas_hbm_copy(x: jax.Array) -> jax.Array:
    """Physical copy of `x` via one raw HBM->HBM DMA (pipeline smoke test)."""
    return pl.pallas_call(
        _hbm_copy_kernel,
        out_shape=jax.ShapeDtypeStruct(x.shape, x.dtype),
        in_specs=[pl.BlockSpec(memory_space=pl.ANY)],
        out_specs=pl.BlockSpec(memory_space=pl.ANY),
        scratch_shapes=[pltpu.SemaphoreType.DMA],
    )(x)


def pallas_identity(x: jax.Array, *, run_smoke_test: bool = False) -> jax.Array:
    """Pass-through.

    Default path elides the kernel entirely — an identity kernel is pure HBM
    read + write for zero semantic work, so not running it is the only change
    that matters on every TPU generation.  Set run_smoke_test=True to
    exercise the Pallas HBM->HBM DMA copy instead.
    """
    if not run_smoke_test:
        return x
    return pallas_hbm_copy(x)


# ----------------------------------------------------------------------------
# JAX-side Discriminator mirroring the (empty) reference module.
# ----------------------------------------------------------------------------
class Discriminator:
    def __init__(self):
        # Reference __init__ registers nothing.
        return

    def forward(self):
        # Reference forward takes no inputs and returns None.
        return None

    def __call__(self):
        return self.forward()


if __name__ == "__main__":
    # Deterministic small example input (what a discriminator would normally
    # consume): batch=2, channels=4, spatial=16x16, NCHW.
    key = jax.random.PRNGKey(0)
    x = jax.random.normal(key, (2, 4, 16, 16), dtype=jnp.float32)

    # 1) Exact semantics of the reference module: forward() -> None.
    disc = Discriminator()
    assert disc() is None

    # 2) Default fast path: identity is elided entirely (no kernel launch).
    y_fast = pallas_identity(x)
    assert y_fast is x

    # 3) Smoke-test path: one HBM->HBM DMA over a lane-dense (16, 128) slab.
    #    2*4*16*16 = 2048 elements reshapes exactly to (16, 128).
    n, c, h, w = x.shape
    x2d = x.reshape(n * c * h * w // 128, 128)

    y2d = pallas_identity(x2d, run_smoke_test=True)
    y2d = jax.block_until_ready(y2d)

    y = np.asarray(y2d).reshape(n, c, h, w)
    assert np.array_equal(y, np.asarray(x)), "Pallas HBM copy mismatch"

    print("KERNEL_OK")
</pallas_src>

<mosaic_0001>
module attributes {stable_mosaic.version = 11 : i64} {
  func.func @_hbm_copy_kernel(%arg0: memref<16x128xf32, #tpu.memory_space<any>>, %arg1: memref<16x128xf32, #tpu.memory_space<any>>, %arg2: memref<!tpu.dma_semaphore, #tpu.memory_space<semaphore_mem>>) attributes {dimension_semantics = [], scalar_prefetch = 0 : i64, scratch_operands = 1 : i64, tpu.core_type = #tpu.core_type<tc>} {
    tpu.enqueue_dma source(%arg0 : memref<16x128xf32, #tpu.memory_space<any>>) target(%arg1 : memref<16x128xf32, #tpu.memory_space<any>>) target_semaphore(%arg2 : memref<!tpu.dma_semaphore, #tpu.memory_space<semaphore_mem>>)
    tpu.wait_dma2 semaphore(%arg2 : memref<!tpu.dma_semaphore, #tpu.memory_space<semaphore_mem>>) src(%arg0 : memref<16x128xf32, #tpu.memory_space<any>>) dst(%arg1 : memref<16x128xf32, #tpu.memory_space<any>>)
    return
  }
}

</mosaic_0001>

<bundles_post_ra>
// kernel: tpu_custom_call.1
= control target key start
LH: loop header
LB: loop body
LE: loop exit
PB: predicated region body
PF: predicated region fallthrough
CT: control target
= control target key end

     0   :  { %s34_s6 = smov [#allocation2]   ;;  %s35_s7 = smov [#allocation3]   ;;  %s53_s0 = inlined_call_operand.hbm [shape: f32[16,128], index: 0, kind: input, shape index: {}]   ;;  %s54_s1 = inlined_call_operand.hbm [shape: f32[16,128], index: 1, kind: output, shape index: {}]  }
   0x1   :  { %s36_s8 = smov 0  }
   0x2   :  { %18 = dma.general %s53_s0, 256, %s54_s1, %s34_s6, %s35_s7, [#allocation4], %s36_s8, 0  }
   0x3   :  { %32 = dma.done.wait [#allocation2], 256 }
   0x4   :  { %33 = vsyncadd [#allocation2], 4294967040 }
   0x5   :  { %22 = vsyncmov [#allocation2] }
   0x8   :  { %s23_s13 = vpop.sfrf %22 }
   0x9   :  { %p28_p0 = scmp.ne.s32.totalorder %s23_s13, 0 }
   0xb   :  { %27 = shalt.err (%p28_p0)  }

</bundles_post_ra>
